<compile_context>
chip_gen: v6e
topology: v6e:2x2x1
jax: 0.10.0
libtpu: 0.0.40
codegen_flags: <defaults>
</compile_context>

<pallas_src>
import jax
import jax.numpy as jnp
from jax.experimental import pallas as pl

NEG_SLOPE = 0.01   # F.leaky_relu default negative_slope
LANES = 128        # TPU lane width


def mlp_kernel(x_ref, w1_ref, b1_ref, w2_ref, b2_ref, o_ref):
    # x_ref: (1, Bp)  -- batch on the lane axis
    # w1_ref, b1_ref, w2_ref: (H, 1) columns; b2_ref: (1, 1)
    x = x_ref[...]                                   # (1, Bp)

    # Hidden layer (F=1): h[j, b] = w1[j] * x[b] + b1[j]   -> pure VPU broadcast FMA
    h = w1_ref[...] * x + b1_ref[...]                # (H, Bp)

    # Leaky ReLU (elementwise, VPU)
    h = jnp.where(h >= 0, h, NEG_SLOPE * h)

    # Output layer (O=1): y[b] = sum_j w2[j] * h[j, b] + b2  -> sublane reduction (XLU)
    y = jnp.sum(w2_ref[...] * h, axis=0, keepdims=True)      # (1, Bp)
    o_ref[...] = (y + b2_ref[...]).astype(o_ref.dtype)


def _full(shape):
    # Whole-array block at grid=()
    return pl.BlockSpec(shape, lambda: (0,) * len(shape))


def prepare_params(w1, b1, w2, b2):
    """One-time parameter re-layout (PyTorch Linear layout -> kernel layout).

    w1: (H, F) with F == 1, b1: (H,), w2: (O, H) with O == 1, b2: (O,).
    Returns (H,1) columns for w1/b1/w2 and a (1,1) b2 -- all broadcast-ready
    against the (1, Bp) lane-batch layout used inside the kernel.
    """
    H, F = w1.shape
    O = w2.shape[0]
    assert F == 1 and O == 1, "kernel is specialized for n_features=1, n_output=1"
    w1c = w1.reshape(H, 1).astype(jnp.float32)
    b1c = b1.reshape(H, 1).astype(jnp.float32)
    w2c = w2.reshape(H, 1).astype(jnp.float32)   # (1,H) -> (H,1) column
    b2s = b2.reshape(1, 1).astype(jnp.float32)
    return w1c, b1c, w2c, b2s


@jax.jit
def net_forward(x, w1c, b1c, w2c, b2s):
    """x: (B, 1) f32.  Prepared params from prepare_params()."""
    B = x.shape[0]
    H = w1c.shape[0]
    Bp = ((B + LANES - 1) // LANES) * LANES      # pad batch to a multiple of 128

    # Put batch on the lane axis, zero-padded; padded lanes are sliced off below.
    x_lanes = jnp.pad(x[:, 0], (0, Bp - B)).reshape(1, Bp).astype(jnp.float32)

    cost = pl.CostEstimate(
        flops=2 * Bp * H * 2,                    # ~ hidden FMA + output reduce
        transcendentals=0,
        bytes_accessed=4 * (Bp + 3 * H + 1 + Bp),
    )

    y = pl.pallas_call(
        mlp_kernel,
        out_shape=jax.ShapeDtypeStruct((1, Bp), jnp.float32),
        grid=(),
        in_specs=[
            _full((1, Bp)),
            _full((H, 1)),
            _full((H, 1)),
            _full((H, 1)),
            _full((1, 1)),
        ],
        out_specs=_full((1, Bp)),
        cost_estimate=cost,
    )(x_lanes, w1c, b1c, w2c, b2s)

    # Drop padded lanes, restore (B, 1) PyTorch-style output.
    return y[0, :B].reshape(B, 1)


def reference_forward(x, w1, b1, w2, b2):
    h = x @ w1.T + b1
    h = jnp.where(h >= 0, h, NEG_SLOPE * h)
    return h @ w2.T + b2


if __name__ == "__main__":
    # Shapes implied by the regression script: x = linspace(-1, 1, 100).unsqueeze(1),
    # Net(n_features=1, n_hidden=32, n_output=1)
    B, F, H, O = 100, 1, 32, 1

    key = jax.random.PRNGKey(0)
    k1, k2, k3, k4 = jax.random.split(key, 4)

    # Deterministic synthetic parameters (PyTorch Linear shapes: (out, in) / (out,))
    w1 = jax.random.normal(k1, (H, F), dtype=jnp.float32) * 0.5
    b1 = jax.random.normal(k2, (H,), dtype=jnp.float32) * 0.1
    w2 = jax.random.normal(k3, (O, H), dtype=jnp.float32) * 0.5
    b2 = jax.random.normal(k4, (O,), dtype=jnp.float32) * 0.1

    # Input matching the original script: 100 points in [-1, 1], shape (100, 1)
    x = jnp.linspace(-1.0, 1.0, B, dtype=jnp.float32).reshape(B, F)

    params = prepare_params(w1, b1, w2, b2)   # one-time re-layout, outside the hot path
    out = net_forward(x, *params)
    out = jax.block_until_ready(out)

    ref = reference_forward(x, w1, b1, w2, b2)
    assert out.shape == (B, O), out.shape
    assert jnp.allclose(out, ref, atol=1e-5, rtol=1e-5), "mismatch vs reference"

    print("KERNEL_OK")
</pallas_src>

<mosaic_0001>
module attributes {stable_mosaic.version = 11 : i64} {
  func.func @mlp_kernel(%arg0: memref<1x128xf32, #tpu.memory_space<vmem>>, %arg1: memref<32x1xf32, #tpu.memory_space<vmem>>, %arg2: memref<32x1xf32, #tpu.memory_space<vmem>>, %arg3: memref<32x1xf32, #tpu.memory_space<vmem>>, %arg4: memref<1x1xf32, #tpu.memory_space<vmem>>, %arg5: memref<1x128xf32, #tpu.memory_space<vmem>>) attributes {dimension_semantics = [], scalar_prefetch = 0 : i64, scratch_operands = 0 : i64, tpu.core_type = #tpu.core_type<tc>} {
    %c0 = arith.constant 0 : index
    %c0_0 = arith.constant 0 : index
    %0 = vector.load %arg0[%c0, %c0_0] : memref<1x128xf32, #tpu.memory_space<vmem>>, vector<1x128xf32>
    %c0_1 = arith.constant 0 : index
    %c0_2 = arith.constant 0 : index
    %1 = vector.load %arg1[%c0_1, %c0_2] : memref<32x1xf32, #tpu.memory_space<vmem>>, vector<32x1xf32>
    %2 = vector.broadcast %1 : vector<32x1xf32> to vector<32x128xf32>
    %3 = vector.broadcast %0 : vector<1x128xf32> to vector<32x128xf32>
    %4 = arith.mulf %2, %3 : vector<32x128xf32>
    %c0_3 = arith.constant 0 : index
    %c0_4 = arith.constant 0 : index
    %5 = vector.load %arg2[%c0_3, %c0_4] : memref<32x1xf32, #tpu.memory_space<vmem>>, vector<32x1xf32>
    %6 = vector.broadcast %5 : vector<32x1xf32> to vector<32x128xf32>
    %7 = arith.addf %4, %6 : vector<32x128xf32>
    %cst = arith.constant 0.000000e+00 : f32
    %8 = vector.broadcast %cst : f32 to vector<32x128xf32>
    %9 = arith.cmpf oge, %7, %8 : vector<32x128xf32>
    %cst_5 = arith.constant 0.00999999977 : f32
    %10 = vector.broadcast %cst_5 : f32 to vector<32x128xf32>
    %11 = arith.mulf %10, %7 : vector<32x128xf32>
    %12 = arith.select %9, %7, %11 : vector<32x128xi1>, vector<32x128xf32>
    %c0_6 = arith.constant 0 : index
    %c0_7 = arith.constant 0 : index
    %13 = vector.load %arg3[%c0_6, %c0_7] : memref<32x1xf32, #tpu.memory_space<vmem>>, vector<32x1xf32>
    %14 = vector.broadcast %13 : vector<32x1xf32> to vector<32x128xf32>
    %15 = arith.mulf %14, %12 : vector<32x128xf32>
    %cst_8 = arith.constant dense<0.000000e+00> : vector<128xf32>
    %16 = vector.multi_reduction <add>, %15, %cst_8 [0] : vector<32x128xf32> to vector<128xf32>
    %17 = vector.shape_cast %16 : vector<128xf32> to vector<1x128xf32>
    %c0_9 = arith.constant 0 : index
    %c0_10 = arith.constant 0 : index
    %18 = vector.load %arg4[%c0_9, %c0_10] : memref<1x1xf32, #tpu.memory_space<vmem>>, vector<1x1xf32>
    %19 = vector.broadcast %18 : vector<1x1xf32> to vector<1x128xf32>
    %20 = arith.addf %17, %19 : vector<1x128xf32>
    %c0_11 = arith.constant 0 : index
    %c0_12 = arith.constant 0 : index
    %21 = vector.load %arg5[%c0_11, %c0_12] : memref<1x128xf32, #tpu.memory_space<vmem>>, vector<1x128xf32>
    tpu.vector_store %arg5[%c0_11, %c0_12], %20 {strides = array<i32>} : memref<1x128xf32, #tpu.memory_space<vmem>>, vector<1x128xf32>,
    return
  }
}

</mosaic_0001>

<bundles_post_ra>
// kernel: net_forward.1
= control target key start
LH: loop header
LB: loop body
LE: loop exit
PB: predicated region body
PF: predicated region fallthrough
CT: control target
= control target key end

     0   :  { %v154_v0 = vmov 0   ;;  %v140_v51 = vlaneseq  ;;  %s230_s1 = inlined_call_operand.vmem [shape: f32[32,1], index: 1, kind: input, shape index: {}]   ;;  %s231_s2 = inlined_call_operand.vmem [shape: f32[32,1], index: 2, kind: input, shape index: {}]   ;;  %s232_s4 = inlined_call_operand.<no memory space> [shape: f32[1,1], index: 4, kind: input, shape index: {}]   ;;  %s233_s3 = inlined_call_operand.vmem [shape: f32[32,1], index: 3, kind: input, shape index: {}]   ;;  %s234_s0 = inlined_call_operand.vmem [shape: f32[1,128], index: 0, kind: input, shape index: {}]   ;;  %s235_s5 = inlined_call_operand.vmem [shape: f32[1,128], index: 5, kind: output, shape index: {}]  }
   0x1   :  { %153 = vset.pattern.permute.xlu1 %v154_v0  ;;  %152 = vset.pattern.permute.xlu0 %v154_v0  ;;  %v25_v1 = vld [vmem:[%s230_s1 + $0x10] sm:$0xff]  ;;  %v23_v2 = vld [vmem:[%s230_s1] sm:$0xff]  ;;  %v10_v3 = vstv %s232_s4  ;;  %v24_v5 = vld [vmem:[%s230_s1 + $0x8] sm:$0xff] }
   0x2   :  { %39 = vperm.xlu1 %153, %v25_v1   ;;  %29 = vperm.xlu0 %152, %v23_v2   ;;  %11 = vst [vmem:[#allocation2] sm:$0x1] %v10_v3  ;;  %v57_v4 = vld [vmem:[%s231_s2] sm:$0xff]  ;;  %v26_v6 = vld [vmem:[%s230_s1 + $0x18] sm:$0xff]  ;;  %v58_v7 = vld [vmem:[%s231_s2 + $0x8] sm:$0xff]  ;;  %v141_v54 = vshrl.u32 %v140_v51, 7 }
   0x3   :  { %v60_v8 = vld [vmem:[%s231_s2 + $0x18] sm:$0xff]  ;;  %v59_v9 = vld [vmem:[%s231_s2 + $0x10] sm:$0xff]  ;;  %v98_v10 = vld [vmem:[%s233_s3 + $0x8] sm:$0xff] }
   0x4   :  { %v97_v11 = vld [vmem:[%s233_s3] sm:$0xff]  ;;  %v100_v12 = vld [vmem:[%s233_s3 + $0x18] sm:$0xff]  ;;  %v99_v13 = vld [vmem:[%s233_s3 + $0x10] sm:$0xff]  ;;  %v142_v56 = vsub.s32 0, %v141_v54 }
   0x5   :  { %v150_v17 = vld [vmem:[%s234_s0] ss:$0 sm:$0xff] }
   0x6   :  { %63 = vperm.xlu1 %153, %v57_v4   ;;  %34 = vperm.xlu0 %152, %v24_v5  }
   0x9   :  { %v134_v14 = vld [vmem:[#allocation2] sm:$0x1] }
   0xa   :  { %44 = vperm.xlu1 %153, %v26_v6   ;;  %68 = vperm.xlu0 %152, %v58_v7  }
   0xe   :  { %78 = vperm.xlu1 %153, %v60_v8   ;;  %73 = vperm.xlu0 %152, %v59_v9  }
  0x12   :  { %108 = vperm.xlu1 %153, %v98_v10   ;;  %103 = vperm.xlu0 %152, %v97_v11  }
  0x16   :  { %118 = vperm.xlu1 %153, %v100_v12   ;;  %113 = vperm.xlu0 %152, %v99_v13  }
  0x1a   :  { %137 = vperm.xlu0 %152, %v134_v14  }
  0x7d   :  { %v40_v15 = vpop.permute.xlu1 %39  ;;  %v30_v16 = vpop.permute.xlu0 %29 }
  0x7e   :  { %v53_v20 = vmul.f32 %v150_v17, %v30_v16  ;;  %v55_v26 = vmul.f32 %v150_v17, %v40_v15 }
  0x81   :  { %v64_v18 = vpop.permute.xlu1 %63  ;;  %v35_v19 = vpop.permute.xlu0 %34 }
  0x82   :  { %v54_v21 = vmul.f32 %v150_v17, %v35_v19  ;;  %v81_v22 = vadd.f32 %v64_v18, %v53_v20 }
  0x84   :  { %v89_v27 = vmul.f32 0.01, %v81_v22  ;;  %vm85_vm1 = vcmp.ge.f32.partialorder %v81_v22, 0.0 }
  0x85   :  { %v45_v23 = vpop.permute.xlu1 %44  ;;  %v69_v24 = vpop.permute.xlu0 %68 }
  0x86   :  { %v82_v25 = vadd.f32 %v69_v24, %v54_v21  ;;  %v56_v28 = vmul.f32 %v150_v17, %v45_v23  ;;  %v93_v38 = vsel %vm85_vm1, %v81_v22, %v89_v27 }
  0x88   :  { %v90_v29 = vmul.f32 0.01, %v82_v25  ;;  %vm86_vm0 = vcmp.ge.f32.partialorder %v82_v25, 0.0 }
  0x89   :  { %v79_v30 = vpop.permute.xlu1 %78  ;;  %v74_v31 = vpop.permute.xlu0 %73 }
  0x8a   :  { %v83_v32 = vadd.f32 %v74_v31, %v55_v26  ;;  %v84_v33 = vadd.f32 %v79_v30, %v56_v28  ;;  %v94_v36 = vsel %vm86_vm0, %v82_v25, %v90_v29 }
  0x8c   :  { %v91_v34 = vmul.f32 0.01, %v83_v32  ;;  %vm87_vm2 = vcmp.ge.f32.partialorder %v83_v32, 0.0  ;;  %v92_v41 = vmul.f32 0.01, %v84_v33  ;;  %vm88_vm3 = vcmp.ge.f32.partialorder %v84_v33, 0.0 }
  0x8d   :  { %v109_v35 = vpop.permute.xlu1 %108  ;;  %v104_v37 = vpop.permute.xlu0 %103 }
  0x8e   :  { %v122_v39 = vmul.f32 %v109_v35, %v94_v36  ;;  %v121_v40 = vmul.f32 %v104_v37, %v93_v38  ;;  %v95_v44 = vsel %vm87_vm2, %v83_v32, %v91_v34  ;;  %v96_v47 = vsel %vm88_vm3, %v84_v33, %v92_v41 }
  0x90   :  { %v125_v45 = vadd.f32 %v122_v39, %v121_v40 }
  0x91   :  { %v119_v42 = vpop.permute.xlu1 %118  ;;  %v114_v43 = vpop.permute.xlu0 %113 }
  0x92   :  { %v123_v46 = vmul.f32 %v114_v43, %v95_v44  ;;  %v124_v48 = vmul.f32 %v119_v42, %v96_v47 }
  0x94   :  { %v126_v49 = vadd.f32 %v125_v45, %v123_v46 }
  0x95   :  { %v138_v58 = vpop.permute.xlu0 %137 }
  0x96   :  { %v127_v50 = vadd.f32 %v126_v49, %v124_v48  ;;  %v143_v61 = vrot.slane %v138_v58, %v142_v56 }
  0x98   :  { %v128_v52 = vrot.slane %v127_v50, 4 }
  0x9a   :  { %v129_v53 = vadd.f32 %v128_v52, %v127_v50 }
  0x9c   :  { %v130_v55 = vrot.slane %v129_v53, 2 }
  0x9e   :  { %v131_v57 = vadd.f32 %v130_v55, %v129_v53 }
  0xa0   :  { %v132_v59 = vrot.slane %v131_v57, 1 }
  0xa2   :  { %v133_v60 = vadd.f32 %v132_v59, %v131_v57 }
  0xa4   :  { %v144_v62 = vadd.f32 %v143_v61, %v133_v60 }
  0xa6   :  { %145 = vst [vmem:[%s235_s5] sm:$0x1] %v144_v62 }

</bundles_post_ra>
